<compile_context>
chip_gen: v7x
topology: tpu7x:2x2x1
jax: 0.10.0
libtpu: 0.0.40
codegen_flags: <defaults>
</compile_context>

<pallas_src>
import functools
import math

import jax
import jax.numpy as jnp
from jax.experimental import pallas as pl
from jax.experimental.pallas import tpu as pltpu

B, S = 2, 8          # batch, sequence length (small demo shapes)
VOCAB = 512          # vocabulary size
D_MODEL = 128        # embedding width (lane-dense: multiple of 128)


def _round_up(x, m):
    return ((x + m - 1) // m) * m


# ------------------------------ Pallas kernel --------------------------------
def _embedding_kernel(ids_ref, table_ref, o_ref, *, scale, vocab):
    # ids:   [TM, 1]  int32   (VMEM, one row-tile of token ids)
    # table: [V,  D]  float32 (VMEM, resident across all grid steps)
    # o:     [TM, D]  float32 (one row-tile of the scaled embeddings)
    ids = ids_ref[...]                                               # [TM, 1]
    pos = jax.lax.broadcasted_iota(jnp.int32, (ids.shape[0], vocab), 1)
    # sqrt(d_model) folded into the one-hot: select writes `scale` where the
    # token matches, 0 elsewhere -> the MXU produces the scaled row directly.
    onehot = jnp.where(pos == ids, scale, 0.0).astype(table_ref.dtype)  # [TM, V]
    o_ref[...] = jnp.dot(onehot, table_ref[...],
                         preferred_element_type=jnp.float32).astype(o_ref.dtype)


# ------------------------------ wrapper ---------------------------------------
def embeddings_forward(x, table, tile_m=256):
    """Embeddings.forward: lut(x) * sqrt(d_model).  x: int [B, S] -> [B, S, D]."""
    Bx, Sx = x.shape
    V, D = table.shape
    M = Bx * Sx

    # Row tile: multiple of 8 (sublane), clamped to the (padded) workload.
    tm = min(tile_m, _round_up(M, 8))
    m_pad = _round_up(M, tm)
    grid = (m_pad // tm,)

    ids = x.reshape(M).astype(jnp.int32)
    if m_pad != M:
        # Pad with id 0 (a valid table row); padded outputs are sliced off.
        ids = jnp.pad(ids, (0, m_pad - M))
    ids2d = ids.reshape(m_pad, 1)

    # Raise the scoped VMEM limit only if the resident table plus
    # double-buffered tiles outgrow the default (16 MiB on v5e, 32 MiB v6e/v7x).
    table_bytes = V * D * table.dtype.itemsize
    vmem_needed = 2 * table_bytes + 2 * tm * (D + 1) * 4 + tm * V * 4
    vmem_limit = None
    if vmem_needed > (16 << 20):
        vmem_limit = min(int(vmem_needed * 5 // 4), 100 << 20)

    # TODO(synk): for a very large vocab (table no longer VMEM-resident,
    # especially on v7x's 64 MiB), switch to a PrefetchScalarGridSpec row
    # gather (token ids as scalar prefetch driving a pl.Element(1) table
    # index_map, or pl.ANY + manual make_async_copy) instead of the
    # one-hot matmul: HBM traffic drops from V*D to M*D and the M*V*D
    # one-hot FLOPs disappear.
    out = pl.pallas_call(
        functools.partial(_embedding_kernel, scale=math.sqrt(D), vocab=V),
        out_shape=jax.ShapeDtypeStruct((m_pad, D), table.dtype),
        grid=grid,
        in_specs=[
            pl.BlockSpec((tm, 1), lambda i: (i, 0)),   # token-id row tile
            pl.BlockSpec((V, D), lambda i: (0, 0)),    # whole table, resident
        ],
        out_specs=pl.BlockSpec((tm, D), lambda i: (i, 0)),
        compiler_params=pltpu.CompilerParams(
            dimension_semantics=("parallel",),         # v7x: shard tiles on 2 TCs
            vmem_limit_bytes=vmem_limit),
    )(ids2d, table)

    return out[:M].reshape(Bx, Sx, D)


# ----------------------------------- main --------------------------------------
if __name__ == "__main__":
    key = jax.random.PRNGKey(0)
    k_ids, k_tab, k_ids2 = jax.random.split(key, 3)

    # Token ids and the nn.Embedding weight table (deterministic).
    x = jax.random.randint(k_ids, (B, S), 0, VOCAB, dtype=jnp.int32)
    lut = jax.random.normal(k_tab, (VOCAB, D_MODEL), jnp.float32)

    scale = math.sqrt(D_MODEL)

    # --- small shape (single tile) -------------------------------------------
    fwd = jax.jit(embeddings_forward)
    out = jax.block_until_ready(fwd(x, lut))
    assert out.shape == (B, S, D_MODEL), out.shape
    assert bool(jnp.all(jnp.isfinite(out)))
    ref = jnp.take(lut, x.reshape(-1), axis=0).reshape(B, S, D_MODEL) * scale
    assert bool(jnp.allclose(out, ref, atol=1e-5, rtol=1e-5))

    # --- larger shape exercising the row-tiled grid + padding path ------------
    B2, S2 = 2, 80                                      # M = 160 -> 3 tiles of 64
    x2 = jax.random.randint(k_ids2, (B2, S2), 0, VOCAB, dtype=jnp.int32)
    fwd_tiled = jax.jit(functools.partial(embeddings_forward, tile_m=64))
    out2 = jax.block_until_ready(fwd_tiled(x2, lut))
    assert out2.shape == (B2, S2, D_MODEL), out2.shape
    ref2 = jnp.take(lut, x2.reshape(-1), axis=0).reshape(B2, S2, D_MODEL) * scale
    assert bool(jnp.allclose(out2, ref2, atol=1e-5, rtol=1e-5))

    print("KERNEL_OK")
</pallas_src>

<mosaic_0001>
module attributes {stable_mosaic.version = 11 : i64} {
  func.func @_embedding_kernel(%arg0: i32, %arg1: memref<16x1xi32, #tpu.memory_space<vmem>>, %arg2: memref<512x128xf32, #tpu.memory_space<vmem>>, %arg3: memref<16x128xf32, #tpu.memory_space<vmem>>) attributes {dimension_semantics = [#tpu.dimension_semantics<parallel>], iteration_bounds = array<i64: 1>, scalar_prefetch = 0 : i64, scratch_operands = 0 : i64, tpu.core_type = #tpu.core_type<tc>, window_params = [{transform_indices = @transform_0, window_bounds = array<i64: 16, 1>}, {pipeline_mode = #tpu.pipeline_mode<synchronous>, transform_indices = @transform_1, window_bounds = array<i64: 512, 128>}, {transform_indices = @transform_2, window_bounds = array<i64: 16, 128>}]} {
    %c0 = arith.constant 0 : index
    %c0_0 = arith.constant 0 : index
    %0 = vector.load %arg1[%c0, %c0_0] : memref<16x1xi32, #tpu.memory_space<vmem>>, vector<16x1xi32>
    %1 = tpu.iota {dimensions = array<i32: 1>} : vector<16x512xi32>
    %2 = vector.broadcast %0 : vector<16x1xi32> to vector<16x512xi32>
    %3 = arith.cmpi eq, %1, %2 : vector<16x512xi32>
    %cst = arith.constant 11.3137083 : f32
    %cst_1 = arith.constant 0.000000e+00 : f32
    %4 = vector.broadcast %cst : f32 to vector<16x512xf32>
    %5 = vector.broadcast %cst_1 : f32 to vector<16x512xf32>
    %6 = arith.select %3, %4, %5 : vector<16x512xi1>, vector<16x512xf32>
    %c0_2 = arith.constant 0 : index
    %c0_3 = arith.constant 0 : index
    %7 = vector.load %arg2[%c0_2, %c0_3] : memref<512x128xf32, #tpu.memory_space<vmem>>, vector<512x128xf32>
    %cst_4 = arith.constant dense<0.000000e+00> : vector<16x128xf32>
    %8 = tpu.matmul %6, %7, %cst_4 {dimension_numbers = #tpu.dot_dimension_numbers<[1], [0], [0], [1], [0, 0, 1, 1], [], []>} : vector<16x512xf32>, vector<512x128xf32>, vector<16x128xf32> -> vector<16x128xf32>
    %c0_5 = arith.constant 0 : index
    %c0_6 = arith.constant 0 : index
    %9 = vector.load %arg3[%c0_5, %c0_6] : memref<16x128xf32, #tpu.memory_space<vmem>>, vector<16x128xf32>
    tpu.vector_store %arg3[%c0_5, %c0_6], %8 {strides = array<i32>} : memref<16x128xf32, #tpu.memory_space<vmem>>, vector<16x128xf32>,
    return
  }
  func.func @transform_0(%arg0: i32) -> (i32, i32) {
    %c0_i32 = arith.constant 0 : i32
    %c0_i32_0 = arith.constant 0 : i32
    return %arg0, %c0_i32 : i32, i32
  }
  func.func @transform_1(%arg0: i32) -> (i32, i32) {
    %c0_i32 = arith.constant 0 : i32
    %c0_i32_0 = arith.constant 0 : i32
    %c0_i32_1 = arith.constant 0 : i32
    return %c0_i32, %c0_i32_0 : i32, i32
  }
  func.func @transform_2(%arg0: i32) -> (i32, i32) {
    %c0_i32 = arith.constant 0 : i32
    %c0_i32_0 = arith.constant 0 : i32
    return %arg0, %c0_i32 : i32, i32
  }
}

</mosaic_0001>

<bundles_post_ra>
// kernel: embeddings_forward.1
= control target key start
LH: loop header
LB: loop body
LE: loop exit
PB: predicated region body
PF: predicated region fallthrough
CT: control target
= control target key end

     0   :  { %7 = vsyncpa [#allocation3], 0  ;;  %s548_s0 = inlined_call_operand.vmem [shape: s32[16,1], index: 0, kind: input, shape index: {}]   ;;  %s549_s1 = inlined_call_operand.hbm [shape: f32[512,128], index: 1, kind: input, shape index: {}]   ;;  %s550_s2 = inlined_call_operand.hbm [shape: f32[16,128], index: 2, kind: output, shape index: {}]  }
   0x1   :  { %8 = vsyncpa [#allocation4], 0  ;;  %s491_s9 = smov [#allocation2]   ;;  %s443_s13 = scalar_lea.hbm %s549_s1, 8192 }
   0x2   :  { %s16_s10 = sshll.u32 %s491_s9, 4  ;;  %p444_p0 = scmp.ne.s32.totalorder %s549_s1, %s443_s13  ;;  %s17_s10 = int_to_ptr.vmem [resolvable:$true] %s16_s10 }
   0x3   :  { %p447_p1 = scmp.lt.u32.totalorder %s443_s13, %s549_s1 }
   0x5   :  { %p449_p2 = pnand %p447_p1, %p444_p0 }
   0x7   :  { %452 = shalt.err (!%p449_p2)
}
   0x8   :  { %s453_s18 = scalar_lea.vmem %s17_s10, 8192  ;;  %p458_p4 = scmp.lt.s32.totalorder %s17_s10, %s17_s10 }
   0x9   :  { %p454_p3 = scmp.ne.s32.totalorder %s17_s10, %s453_s18  ;;  %p459_p5 = scmp.lt.s32.totalorder %s453_s18, %s453_s18 }
   0xb   :  { %p460_p6 = por %p459_p5, %p458_p4 }
   0xd   :  { %p461_p7 = pnand %p460_p6, %p454_p3 }
   0xf   :  { %464 = shalt.err (!%p461_p7)
}
  0x10   :  { %s492_s19 = smov 128   ;;  %s493_s20 = smov 8  }
  0x11   :  { %22 = dma.hbm_to_vmem [thread:$0]  %s549_s1, 8192, %s17_s10, [#allocation3], %s492_s19, %s492_s19, %s493_s20  }
  0x12   :  { %487 = dma.done.wait [#allocation3], 8192  }
  0x13   :  { %488 = vsyncadd [#allocation3], 4294959104  ;;  %v494_v0 = vmov 0   ;;  %v26_v1 = vld [vmem:[%s548_s0] sm:$0xff]  ;;  %v27_v2 = vld [vmem:[%s548_s0 + $0x8] sm:$0xff]  ;;  %s496_s0 = smov [#allocation5]  }
  0x14   :  { %442 = vset.pattern.permute.xlu0 %v494_v0  ;;  %v71_v3 = vld [vmem:[#allocation2 + $0x80] sm:$0xff]  ;;  %v72_v4 = vld [vmem:[#allocation2 + $0x88] sm:$0xff]  ;;  %v73_v14 = vld [vmem:[#allocation2 + $0x90] sm:$0xff]  ;;  %s276_s1 = sshll.u32 %s496_s0, 4  ;;  %s277_s1 = int_to_ptr.vmem [resolvable:$true] %s276_s1 }
  0x15   :  { %34 = vperm.xlu0 %442, %v26_v1   ;;  %v103_v5 = vld [vmem:[#allocation2 + $0x180] sm:$0xff]  ;;  %v104_v6 = vld [vmem:[#allocation2 + $0x188] sm:$0xff]  ;;  %v372_v7 = vpack.c.bf16 %v72_v4, %v71_v3  ;;  %v74_v15 = vld [vmem:[#allocation2 + $0x98] sm:$0xff]  ;;  %s465_s27 = scalar_lea.vmem %s277_s1, 256  ;;  %p470_p9 = scmp.lt.s32.totalorder %s277_s1, %s277_s1 }
  0x16   :  { %v404_v8 = vpack.c.bf16 %v104_v6, %v103_v5  ;;  %v55_v9 = vld [vmem:[#allocation2] sm:$0xff]  ;;  %v56_v10 = vld [vmem:[#allocation2 + $0x8] sm:$0xff]  ;;  %v376_v17 = vpack.c.bf16 %v74_v15, %v73_v14  ;;  %v105_v18 = vld [vmem:[#allocation2 + $0x190] sm:$0xff]  ;;  %p466_p8 = scmp.ne.s32.totalorder %s277_s1, %s465_s27  ;;  %p471_p10 = scmp.lt.s32.totalorder %s465_s27, %s465_s27 }
  0x17   :  { %v87_v11 = vld [vmem:[#allocation2 + $0x100] sm:$0xff]  ;;  %v374_v12 = vpack.c.bf16 %v56_v10, %v55_v9  ;;  %v88_v13 = vld [vmem:[#allocation2 + $0x108] sm:$0xff]  ;;  %373 = vmatprep.subr.bf16.mxu0 %v372_v7  ;;  %v106_v19 = vld [vmem:[#allocation2 + $0x198] sm:$0xff] }
  0x18   :  { %405 = vmatprep.subr.bf16.mxu1 %v404_v8  ;;  %v406_v16 = vpack.c.bf16 %v88_v13, %v87_v11  ;;  %v57_v20 = vld [vmem:[#allocation2 + $0x10] sm:$0xff]  ;;  %v408_v21 = vpack.c.bf16 %v106_v19, %v105_v18  ;;  %v58_v22 = vld [vmem:[#allocation2 + $0x18] sm:$0xff]  ;;  %v75_v27 = vld [vmem:[#allocation2 + $0xa0] sm:$0xff]  ;;  %p472_p11 = por %p471_p10, %p470_p9 }
  0x19   :  { %37 = vperm.xlu0 %442, %v27_v2   ;;  %375 = vmatpush3.bf16.msra.mxu0 %v374_v12  ;;  %v89_v23 = vld [vmem:[#allocation2 + $0x110] sm:$0xff]  ;;  %v90_v24 = vld [vmem:[#allocation2 + $0x118] sm:$0xff]  ;;  %v378_v25 = vpack.c.bf16 %v58_v22, %v57_v20  ;;  %v76_v28 = vld [vmem:[#allocation2 + $0xa8] sm:$0xff] }
  0x1a   :  { %407 = vmatpush3.bf16.msra.mxu1 %v406_v16  ;;  %377 = vmatprep.subr.bf16.mxu0 %v376_v17  ;;  %v410_v26 = vpack.c.bf16 %v90_v24, %v89_v23  ;;  %v107_v29 = vld [vmem:[#allocation2 + $0x1a0] sm:$0xff]  ;;  %v380_v30 = vpack.c.bf16 %v76_v28, %v75_v27  ;;  %v108_v31 = vld [vmem:[#allocation2 + $0x1a8] sm:$0xff]  ;;  %v77_v37 = vld [vmem:[#allocation2 + $0xb0] sm:$0xff]  ;;  %p473_p12 = pnand %p472_p11, %p466_p8 }
  0x1b   :  { %409 = vmatprep.subr.bf16.mxu1 %v408_v21  ;;  %v59_v32 = vld [vmem:[#allocation2 + $0x20] sm:$0xff]  ;;  %v60_v33 = vld [vmem:[#allocation2 + $0x28] sm:$0xff]  ;;  %v412_v34 = vpack.c.bf16 %v108_v31, %v107_v29  ;;  %v78_v39 = vld [vmem:[#allocation2 + $0xb8] sm:$0xff] }
  0x1c   :  { %v91_v35 = vld [vmem:[#allocation2 + $0x120] sm:$0xff]  ;;  %v92_v36 = vld [vmem:[#allocation2 + $0x128] sm:$0xff]  ;;  %v382_v38 = vpack.c.bf16 %v60_v33, %v59_v32  ;;  %v109_v40 = vld [vmem:[#allocation2 + $0x1b0] sm:$0xff]  ;;  %v384_v43 = vpack.c.bf16 %v78_v39, %v77_v37 }
  0x1d   :  { %379 = vmatpush3.bf16.msra.mxu0 %v378_v25  ;;  %v110_v41 = vld [vmem:[#allocation2 + $0x1b8] sm:$0xff]  ;;  %v414_v42 = vpack.c.bf16 %v92_v36, %v91_v35  ;;  %v61_v44 = vld [vmem:[#allocation2 + $0x30] sm:$0xff]  ;;  %v79_v49 = vld [vmem:[#allocation2 + $0xc0] sm:$0xff]  ;;  %v28_v35 = vlaneseq }
  0x1e   :  { %411 = vmatpush3.bf16.msra.mxu1 %v410_v26  ;;  %381 = vmatprep.subr.bf16.mxu0 %v380_v30  ;;  %v62_v45 = vld [vmem:[#allocation2 + $0x38] sm:$0xff]  ;;  %v93_v46 = vld [vmem:[#allocation2 + $0x130] sm:$0xff]  ;;  %v416_v47 = vpack.c.bf16 %v110_v41, %v109_v40  ;;  %v80_v50 = vld [vmem:[#allocation2 + $0xc8] sm:$0xff]  ;;  %v495_v41 = vmov 11.313708  }
  0x1f   :  { %413 = vmatprep.subr.bf16.mxu1 %v412_v34  ;;  %v94_v48 = vld [vmem:[#allocation2 + $0x138] sm:$0xff]  ;;  %v111_v51 = vld [vmem:[#allocation2 + $0x1c0] sm:$0xff]  ;;  %v112_v52 = vld [vmem:[#allocation2 + $0x1c8] sm:$0xff]  ;;  %v386_v53 = vpack.c.bf16 %v62_v45, %v61_v44  ;;  %v388_v55 = vpack.c.bf16 %v80_v50, %v79_v49  ;;  %v29_v36 = vand.u32 127, %v28_v35 }
  0x20   :  { %v418_v54 = vpack.c.bf16 %v94_v48, %v93_v46  ;;  %v63_v56 = vld [vmem:[#allocation2 + $0x40] sm:$0xff]  ;;  %v64_v57 = vld [vmem:[#allocation2 + $0x48] sm:$0xff]  ;;  %v420_v59 = vpack.c.bf16 %v112_v52, %v111_v51  ;;  %v81_v61 = vld [vmem:[#allocation2 + $0xd0] sm:$0xff] }
  0x21   :  { %383 = vmatpush3.bf16.msra.mxu0 %v382_v38  ;;  %v95_v58 = vld [vmem:[#allocation2 + $0x140] sm:$0xff]  ;;  %v96_v60 = vld [vmem:[#allocation2 + $0x148] sm:$0xff]  ;;  %v82_v62 = vld [vmem:[#allocation2 + $0xd8] sm:$0xff]  ;;  %v390_v1 = vpack.c.bf16 %v64_v57, %v63_v56  ;;  %v30_v37 = vadd.s32 128, %v29_v36  ;;  %v32_v38 = vadd.s32 384, %v29_v36  ;;  %v31_v39 = vadd.s32 256, %v29_v36 }
  0x22   :  { %415 = vmatpush3.bf16.msra.mxu1 %v414_v42  ;;  %385 = vmatprep.subr.bf16.mxu0 %v384_v43  ;;  %v113_v63 = vld [vmem:[#allocation2 + $0x1d0] sm:$0xff]  ;;  %v114_v0 = vld [vmem:[#allocation2 + $0x1d8] sm:$0xff]  ;;  %v422_v2 = vpack.c.bf16 %v96_v60, %v95_v58  ;;  %v392_v3 = vpack.c.bf16 %v82_v62, %v81_v61  ;;  %v83_v9 = vld [vmem:[#allocation2 + $0xe0] sm:$0xff] }
  0x23   :  { %417 = vmatprep.subr.bf16.mxu1 %v416_v47  ;;  %v65_v4 = vld [vmem:[#allocation2 + $0x50] sm:$0xff]  ;;  %v66_v5 = vld [vmem:[#allocation2 + $0x58] sm:$0xff]  ;;  %v424_v7 = vpack.c.bf16 %v114_v0, %v113_v63  ;;  %v84_v10 = vld [vmem:[#allocation2 + $0xe8] sm:$0xff] }
  0x24   :  { %v97_v6 = vld [vmem:[#allocation2 + $0x150] sm:$0xff]  ;;  %v98_v8 = vld [vmem:[#allocation2 + $0x158] sm:$0xff]  ;;  %v115_v11 = vld [vmem:[#allocation2 + $0x1e0] sm:$0xff]  ;;  %v394_v13 = vpack.c.bf16 %v66_v5, %v65_v4  ;;  %v396_v15 = vpack.c.bf16 %v84_v10, %v83_v9 }
  0x25   :  { %387 = vmatpush3.bf16.msra.mxu0 %v386_v53  ;;  %v116_v12 = vld [vmem:[#allocation2 + $0x1e8] sm:$0xff]  ;;  %v426_v14 = vpack.c.bf16 %v98_v8, %v97_v6  ;;  %v67_v16 = vld [vmem:[#allocation2 + $0x60] sm:$0xff]  ;;  %v85_v21 = vld [vmem:[#allocation2 + $0xf0] sm:$0xff] }
  0x26   :  { %419 = vmatpush3.bf16.msra.mxu1 %v418_v54  ;;  %389 = vmatprep.subr.bf16.mxu0 %v388_v55  ;;  %v68_v17 = vld [vmem:[#allocation2 + $0x68] sm:$0xff]  ;;  %v99_v18 = vld [vmem:[#allocation2 + $0x160] sm:$0xff]  ;;  %v428_v19 = vpack.c.bf16 %v116_v12, %v115_v11  ;;  %v86_v22 = vld [vmem:[#allocation2 + $0xf8] sm:$0xff] }
  0x27   :  { %421 = vmatprep.subr.bf16.mxu1 %v420_v59  ;;  %v100_v20 = vld [vmem:[#allocation2 + $0x168] sm:$0xff]  ;;  %v117_v23 = vld [vmem:[#allocation2 + $0x1f0] sm:$0xff]  ;;  %v118_v24 = vld [vmem:[#allocation2 + $0x1f8] sm:$0xff]  ;;  %v398_v25 = vpack.c.bf16 %v68_v17, %v67_v16  ;;  %v400_v27 = vpack.c.bf16 %v86_v22, %v85_v21 }
  0x28   :  { %v430_v26 = vpack.c.bf16 %v100_v20, %v99_v18  ;;  %v69_v28 = vld [vmem:[#allocation2 + $0x70] sm:$0xff]  ;;  %v70_v29 = vld [vmem:[#allocation2 + $0x78] sm:$0xff]  ;;  %v432_v30 = vpack.c.bf16 %v118_v24, %v117_v23 }
  0x29   :  { %391 = vmatpush3.bf16.msra.mxu0 %v390_v1  ;;  %v101_v31 = vld [vmem:[#allocation2 + $0x170] sm:$0xff]  ;;  %v102_v32 = vld [vmem:[#allocation2 + $0x178] sm:$0xff]  ;;  %v402_v33 = vpack.c.bf16 %v70_v29, %v69_v28 }
  0x2a   :  { %423 = vmatpush3.bf16.msra.mxu1 %v422_v2  ;;  %393 = vmatprep.subr.bf16.mxu0 %v392_v3  ;;  %v434_v34 = vpack.c.bf16 %v102_v32, %v101_v31 }
  0x2b   :  { %425 = vmatprep.subr.bf16.mxu1 %v424_v7 }
  0x2d   :  { %395 = vmatpush3.bf16.msra.mxu0 %v394_v13 }
  0x2e   :  { %427 = vmatpush3.bf16.msra.mxu1 %v426_v14  ;;  %397 = vmatprep.subr.bf16.mxu0 %v396_v15 }
  0x2f   :  { %429 = vmatprep.subr.bf16.mxu1 %v428_v19 }
  0x31   :  { %399 = vmatpush3.bf16.msra.mxu0 %v398_v25 }
  0x32   :  { %431 = vmatpush3.bf16.msra.mxu1 %v430_v26  ;;  %401 = vmatprep.subr.bf16.mxu0 %v400_v27 }
  0x33   :  { %433 = vmatprep.subr.bf16.mxu1 %v432_v30 }
  0x35   :  { %403 = vmatpush3.bf16.msra.mxu0 %v402_v33 }
  0x36   :  { %435 = vmatpush3.bf16.msra.mxu1 %v434_v34 }
  0x94   :  { %v35_v40 = vpop.permute.xlu0 %34 }
  0x95   :  { %vm40_vm0 = vcmp.eq.s32.totalorder %v30_v37, %v35_v40  ;;  %vm42_vm1 = vcmp.eq.s32.totalorder %v32_v38, %v35_v40  ;;  %vm39_vm2 = vcmp.eq.s32.totalorder %v29_v36, %v35_v40  ;;  %vm41_vm3 = vcmp.eq.s32.totalorder %v31_v39, %v35_v40 }
  0x96   :  { %288 = vmatprep.mubr.msk.f32.mxu0 %vm40_vm0, %v495_v41  ;;  %292 = vmatprep.mubr.msk.f32.mxu1 %vm42_vm1, %v495_v41 }
  0x97   :  { %289 = vmatmul.mubr.msk.f32.vlgmr.msra.gmra.mrb[0].mxu0 %vm39_vm2, %v495_v41  ;;  %293 = vmatmul.mubr.msk.f32.vlgmr.msra.gmra.mrb[0].mxu1 %vm41_vm3, %v495_v41 }
  0x98   :  { %v38_v42 = vpop.permute.xlu0 %37 }
  0x99   :  { %vm44_vm4 = vcmp.eq.s32.totalorder %v30_v37, %v38_v42  ;;  %vm46_vm5 = vcmp.eq.s32.totalorder %v32_v38, %v38_v42  ;;  %vm43_vm6 = vcmp.eq.s32.totalorder %v29_v36, %v38_v42  ;;  %vm45_vm7 = vcmp.eq.s32.totalorder %v31_v39, %v38_v42 }
  0x9a   :  { %290 = vmatprep.mubr.msk.f32.mxu0 %vm44_vm4, %v495_v41  ;;  %294 = vmatprep.mubr.msk.f32.mxu1 %vm46_vm5, %v495_v41 }
  0x9b   :  { %291 = vmatmul.mubr.msk.f32.gmra.mrb[2].mxu0 %vm43_vm6, %v495_v41  ;;  %295 = vmatmul.mubr.msk.f32.gmra.mrb[2].mxu1 %vm45_vm7, %v495_v41 }
 0x16a   :  { %v328_v43 = vpop.f32.mrb[0].mxu0  ;;  %v366_v44 = vpop.f32.mrb[0].mxu1 }
 0x16b   :  { %v329_v45 = vpop.f32.mrb[1].mxu0  ;;  %v367_v46 = vpop.f32.mrb[1].mxu1 }
 0x16c   :  { %v330_v47 = vadd.f32 %v329_v45, %v328_v43  ;;  %v368_v48 = vadd.f32 %v367_v46, %v366_v44 }
 0x16e   :  { %v261_v49 = vadd.f32 %v368_v48, %v330_v47  ;;  %v331_v50 = vpop.f32.mrb[2].mxu0  ;;  %v369_v51 = vpop.f32.mrb[2].mxu1 }
 0x16f   :  { %v332_v52 = vpop.f32.mrb[3].mxu0  ;;  %v370_v53 = vpop.f32.mrb[3].mxu1 }
 0x170   :  { %269 = vst [vmem:[#allocation5] sm:$0xff] %v261_v49  ;;  %v333_v54 = vadd.f32 %v332_v52, %v331_v50  ;;  %v371_v55 = vadd.f32 %v370_v53, %v369_v51 }
 0x172   :  { %v266_v56 = vadd.f32 %v371_v55, %v333_v54 }
 0x174   :  { %270 = vst [vmem:[#allocation5 + $0x8] sm:$0xff] %v266_v56 }
 0x175   :  { %476 = shalt.err (!%p473_p12)
}
 0x176   :  { %s477_s30 = scalar_lea.hbm %s550_s2, 256 }
 0x177   :  { %p478_p13 = scmp.ne.s32.totalorder %s550_s2, %s477_s30  ;;  %p481_p0 = scmp.lt.u32.totalorder %s477_s30, %s550_s2 }
 0x179   :  { %p483_p1 = pnand %p481_p0, %p478_p13 }
 0x17b   :  { %486 = shalt.err (!%p483_p1)
}
 0x17c   :  { %282 = dma.vmem_to_hbm [thread:$0]  %s277_s1, 256, %s550_s2, [#allocation4], %s492_s19, %s492_s19, %s493_s20  }
 0x17d   :  { %489 = dma.done.wait [#allocation4], 256  }
 0x17e   :  { %490 = vsyncadd [#allocation4], 4294967040 }
 0x17f   :  { %286 = vsyncpa [#allocation3], 1 }
 0x180   :  { %287 = vsyncpa [#allocation4], 1 }

</bundles_post_ra>
